<compile_context>
chip_gen: v7x
topology: tpu7x:2x2x1
jax: 0.10.0
libtpu: 0.0.40
codegen_flags: <defaults>
</compile_context>

<pallas_src>
import functools

import jax
import jax.numpy as jnp
from jax.experimental import pallas as pl
from jax.experimental.pallas import tpu as pltpu


# ----------------------------------------------------------------------------
# Fused kernel: combined matmul + bias, split into DOA and sigmoid(conf)
# ----------------------------------------------------------------------------
def _mh_output_kernel(x_ref, w_ref, b_ref, doa_ref, conf_ref, *, n_doa):
    # x_ref: [TM, D]   w_ref: [D, n_doa + n_conf]   b_ref: [1, n_doa + n_conf]
    y = jnp.dot(x_ref[...], w_ref[...],
                preferred_element_type=jnp.float32) + b_ref[...]
    doa_ref[...] = y[:, :n_doa].astype(doa_ref.dtype)
    conf_logits = y[:, n_doa:]
    conf_ref[...] = (1.0 / (1.0 + jnp.exp(-conf_logits))).astype(conf_ref.dtype)


def _round_up(x, m):
    return (x + m - 1) // m * m


def _pick_row_block(m, max_block=1024):
    """Return (row_tile, padded_rows): tile is a multiple of 8 dividing padded_rows."""
    m8 = _round_up(m, 8)
    if m8 <= max_block:
        return m8, m8
    # Prefer an exact divisor of the 8-rounded row count (zero extra padding).
    for cand in range(max_block, 7, -8):
        if m8 % cand == 0:
            return cand, m8
    # Otherwise pad rows up to a multiple of max_block.
    return max_block, _round_up(m8, max_block)


def mh_localization_output(x, w_doa, b_doa, w_conf, b_conf):
    """x: [B, T, D] -> (doa [B, T, K, out_dim], conf [B, T, K, 1]).

    w_doa: [D, K*out_dim] (hypothesis-major columns), b_doa: [K*out_dim]
    w_conf: [D, K],                                   b_conf: [K]
    """
    B, T, D = x.shape
    n_doa = w_doa.shape[1]
    n_conf = w_conf.shape[1]
    K = n_conf
    out_dim = n_doa // K
    ncomb = n_doa + n_conf

    M = B * T
    x2 = x.reshape(M, D)

    tm, m_pad = _pick_row_block(M)
    if m_pad != M:
        x2 = jnp.pad(x2, ((0, m_pad - M), (0, 0)))
    grid = (m_pad // tm,)

    # Fold all 2K per-hypothesis layers into one combined weight / bias.
    w = jnp.concatenate([w_doa, w_conf], axis=1)                   # [D, ncomb]
    b = jnp.concatenate([b_doa, b_conf], axis=0).reshape(1, ncomb)

    kernel = functools.partial(_mh_output_kernel, n_doa=n_doa)
    doa2, conf2 = pl.pallas_call(
        kernel,
        out_shape=(jax.ShapeDtypeStruct((m_pad, n_doa), jnp.float32),
                   jax.ShapeDtypeStruct((m_pad, n_conf), jnp.float32)),
        grid=grid,
        in_specs=[
            pl.BlockSpec((tm, D), lambda i: (i, 0)),
            pl.BlockSpec((D, ncomb), lambda i: (0, 0)),   # resident in VMEM
            pl.BlockSpec((1, ncomb), lambda i: (0, 0)),   # resident in VMEM
        ],
        out_specs=(
            pl.BlockSpec((tm, n_doa), lambda i: (i, 0)),
            pl.BlockSpec((tm, n_conf), lambda i: (i, 0)),
        ),
        compiler_params=pltpu.CompilerParams(
            dimension_semantics=("parallel",)),
    )(x2, w, b)

    if m_pad != M:
        doa2 = doa2[:M]
        conf2 = conf2[:M]

    hyp_stacked = doa2.reshape(B, T, K, out_dim)
    conf_stacked = conf2.reshape(B, T, K, 1)
    return hyp_stacked, conf_stacked


# ----------------------------------------------------------------------------
# Deterministic parameter init (combined-weight layout, hypothesis-major cols)
# ----------------------------------------------------------------------------
def init_params(key, input_dim, num_hypothesis, output_dim):
    kd, kdb, kc, kcb = jax.random.split(key, 4)
    bound = 1.0 / float(input_dim) ** 0.5
    w_doa = bound * jax.random.normal(
        kd, (input_dim, num_hypothesis * output_dim), jnp.float32)
    b_doa = bound * jax.random.normal(
        kdb, (num_hypothesis * output_dim,), jnp.float32)
    w_conf = bound * jax.random.normal(
        kc, (input_dim, num_hypothesis), jnp.float32)
    b_conf = bound * jax.random.normal(kcb, (num_hypothesis,), jnp.float32)
    return {"w_doa": w_doa, "b_doa": b_doa,
            "w_conf": w_conf, "b_conf": b_conf}


# ----------------------------------------------------------------------------
# Pure-JAX reference mirroring the PyTorch per-hypothesis loop + stack
# ----------------------------------------------------------------------------
def mh_localization_output_ref(x, w_doa, b_doa, w_conf, b_conf,
                               num_hypothesis, output_dim):
    B, T, D = x.shape
    xr = x.reshape(-1, D)
    doas, confs = [], []
    for k in range(num_hypothesis):
        wk = w_doa[:, k * output_dim:(k + 1) * output_dim]
        bk = b_doa[k * output_dim:(k + 1) * output_dim]
        doas.append((xr @ wk + bk).reshape(B, T, output_dim))
        wc = w_conf[:, k:k + 1]
        bc = b_conf[k:k + 1]
        logits = xr @ wc + bc
        confs.append((1.0 / (1.0 + jnp.exp(-logits))).reshape(B, T, 1))
    return jnp.stack(doas, axis=-2), jnp.stack(confs, axis=-2)


if __name__ == "__main__":
    # Small shapes consistent with the module: batch=2, T=num_steps=8,
    # input_dim=128, num_hypothesis=8, output_dim=2 (azimuth, elevation).
    batch, T, input_dim = 2, 8, 128
    num_hypothesis, output_dim = 8, 2

    key = jax.random.PRNGKey(0)
    kx, kp = jax.random.split(key)
    x = jax.random.normal(kx, (batch, T, input_dim), dtype=jnp.float32)
    params = init_params(kp, input_dim, num_hypothesis, output_dim)

    fwd = jax.jit(lambda xx, p: mh_localization_output(
        xx, p["w_doa"], p["b_doa"], p["w_conf"], p["b_conf"]))
    hyp, conf = fwd(x, params)
    (hyp, conf) = jax.block_until_ready((hyp, conf))

    assert hyp.shape == (batch, T, num_hypothesis, output_dim), hyp.shape
    assert conf.shape == (batch, T, num_hypothesis, 1), conf.shape

    hyp_ref, conf_ref = mh_localization_output_ref(
        x, params["w_doa"], params["b_doa"], params["w_conf"],
        params["b_conf"], num_hypothesis, output_dim)
    err_hyp = float(jnp.max(jnp.abs(hyp - hyp_ref)))
    err_conf = float(jnp.max(jnp.abs(conf - conf_ref)))
    assert err_hyp < 1e-4, f"DOA mismatch vs reference: {err_hyp}"
    assert err_conf < 1e-5, f"confidence mismatch vs reference: {err_conf}"

    print("KERNEL_OK")
</pallas_src>

<mosaic_0001>
module attributes {stable_mosaic.version = 11 : i64} {
  func.func @_mh_output_kernel(%arg0: i32, %arg1: memref<16x128xf32, #tpu.memory_space<vmem>>, %arg2: memref<128x24xf32, #tpu.memory_space<vmem>>, %arg3: memref<1x24xf32, #tpu.memory_space<vmem>>, %arg4: memref<16x16xf32, #tpu.memory_space<vmem>>, %arg5: memref<16x8xf32, #tpu.memory_space<vmem>>) attributes {dimension_semantics = [#tpu.dimension_semantics<parallel>], iteration_bounds = array<i64: 1>, scalar_prefetch = 0 : i64, scratch_operands = 0 : i64, tpu.core_type = #tpu.core_type<tc>, window_params = [{transform_indices = @transform_0, window_bounds = array<i64: 16, 128>}, {pipeline_mode = #tpu.pipeline_mode<synchronous>, transform_indices = @transform_1, window_bounds = array<i64: 128, 24>}, {pipeline_mode = #tpu.pipeline_mode<synchronous>, transform_indices = @transform_2, window_bounds = array<i64: 1, 24>}, {transform_indices = @transform_3, window_bounds = array<i64: 16, 16>}, {transform_indices = @transform_4, window_bounds = array<i64: 16, 8>}]} {
    %c0 = arith.constant 0 : index
    %c0_0 = arith.constant 0 : index
    %0 = vector.load %arg1[%c0, %c0_0] : memref<16x128xf32, #tpu.memory_space<vmem>>, vector<16x128xf32>
    %c0_1 = arith.constant 0 : index
    %c0_2 = arith.constant 0 : index
    %1 = vector.load %arg2[%c0_1, %c0_2] : memref<128x24xf32, #tpu.memory_space<vmem>>, vector<128x24xf32>
    %cst = arith.constant dense<0.000000e+00> : vector<16x24xf32>
    %2 = tpu.matmul %0, %1, %cst {dimension_numbers = #tpu.dot_dimension_numbers<[1], [0], [0], [1], [0, 0, 1, 1], [], []>} : vector<16x128xf32>, vector<128x24xf32>, vector<16x24xf32> -> vector<16x24xf32>
    %c0_3 = arith.constant 0 : index
    %c0_4 = arith.constant 0 : index
    %3 = vector.load %arg3[%c0_3, %c0_4] : memref<1x24xf32, #tpu.memory_space<vmem>>, vector<1x24xf32>
    %4 = vector.broadcast %3 : vector<1x24xf32> to vector<16x24xf32>
    %5 = arith.addf %2, %4 : vector<16x24xf32>
    %6 = vector.extract_strided_slice %5 {offsets = [0, 0], sizes = [16, 16], strides = [1, 1]} : vector<16x24xf32> to vector<16x16xf32>
    %c0_5 = arith.constant 0 : index
    %c0_6 = arith.constant 0 : index
    %7 = vector.load %arg4[%c0_5, %c0_6] : memref<16x16xf32, #tpu.memory_space<vmem>>, vector<16x16xf32>
    tpu.vector_store %arg4[%c0_5, %c0_6], %6 {strides = array<i32>} : memref<16x16xf32, #tpu.memory_space<vmem>>, vector<16x16xf32>,
    %8 = vector.extract_strided_slice %5 {offsets = [0, 16], sizes = [16, 8], strides = [1, 1]} : vector<16x24xf32> to vector<16x8xf32>
    %cst_7 = arith.constant 0.000000e+00 : f32
    %9 = vector.broadcast %cst_7 : f32 to vector<16x8xf32>
    %10 = arith.subf %9, %8 : vector<16x8xf32>
    %11 = math.exp %10 : vector<16x8xf32>
    %cst_8 = arith.constant 1.000000e+00 : f32
    %12 = vector.broadcast %cst_8 : f32 to vector<16x8xf32>
    %13 = arith.addf %12, %11 : vector<16x8xf32>
    %cst_9 = arith.constant 1.000000e+00 : f32
    %14 = vector.broadcast %cst_9 : f32 to vector<16x8xf32>
    %15 = arith.divf %14, %13 : vector<16x8xf32>
    %c0_10 = arith.constant 0 : index
    %c0_11 = arith.constant 0 : index
    %16 = vector.load %arg5[%c0_10, %c0_11] : memref<16x8xf32, #tpu.memory_space<vmem>>, vector<16x8xf32>
    tpu.vector_store %arg5[%c0_10, %c0_11], %15 {strides = array<i32>} : memref<16x8xf32, #tpu.memory_space<vmem>>, vector<16x8xf32>,
    return
  }
  func.func @transform_0(%arg0: i32) -> (i32, i32) {
    %c0_i32 = arith.constant 0 : i32
    %c0_i32_0 = arith.constant 0 : i32
    return %arg0, %c0_i32 : i32, i32
  }
  func.func @transform_1(%arg0: i32) -> (i32, i32) {
    %c0_i32 = arith.constant 0 : i32
    %c0_i32_0 = arith.constant 0 : i32
    %c0_i32_1 = arith.constant 0 : i32
    return %c0_i32, %c0_i32_0 : i32, i32
  }
  func.func @transform_2(%arg0: i32) -> (i32, i32) {
    %c0_i32 = arith.constant 0 : i32
    %c0_i32_0 = arith.constant 0 : i32
    %c0_i32_1 = arith.constant 0 : i32
    return %c0_i32, %c0_i32_0 : i32, i32
  }
  func.func @transform_3(%arg0: i32) -> (i32, i32) {
    %c0_i32 = arith.constant 0 : i32
    %c0_i32_0 = arith.constant 0 : i32
    return %arg0, %c0_i32 : i32, i32
  }
  func.func @transform_4(%arg0: i32) -> (i32, i32) {
    %c0_i32 = arith.constant 0 : i32
    %c0_i32_0 = arith.constant 0 : i32
    return %arg0, %c0_i32 : i32, i32
  }
}

</mosaic_0001>

<bundles_post_ra>
// kernel: _lambda_.1
= control target key start
LH: loop header
LB: loop body
LE: loop exit
PB: predicated region body
PF: predicated region fallthrough
CT: control target
= control target key end

     0   :  { %s389_s0 = inlined_call_operand.vmem [shape: f32[16,128], index: 0, kind: input, shape index: {}]   ;;  %s390_s1 = inlined_call_operand.vmem [shape: f32[128,24], index: 1, kind: input, shape index: {}]   ;;  %s391_s2 = inlined_call_operand.vmem [shape: f32[1,24], index: 2, kind: input, shape index: {}]   ;;  %s392_s3 = inlined_call_operand.vmem [shape: f32[16,16], index: 3, kind: output, shape index: {0}]   ;;  %s393_s4 = inlined_call_operand.hbm [shape: f32[16,8], index: 4, kind: output, shape index: {1}]  }
   0x1   :  { %v19_v0 = vld [vmem:[%s390_s1] sm:$0xff]  ;;  %v20_v1 = vld [vmem:[%s390_s1 + $0x8] sm:$0xff]  ;;  %v21_v2 = vld [vmem:[%s390_s1 + $0x10] sm:$0xff] }
   0x2   :  { %v217_v3 = vpack.c.bf16 %v20_v1, %v19_v0  ;;  %v22_v4 = vld [vmem:[%s390_s1 + $0x18] sm:$0xff]  ;;  %v23_v6 = vld [vmem:[%s390_s1 + $0x20] sm:$0xff]  ;;  %v24_v7 = vld [vmem:[%s390_s1 + $0x28] sm:$0xff] }
   0x3   :  { %v221_v5 = vpack.c.bf16 %v22_v4, %v21_v2  ;;  %v225_v8 = vpack.c.bf16 %v24_v7, %v23_v6  ;;  %v17_v9 = vld [vmem:[%s389_s0] sm:$0xff]  ;;  %v25_v10 = vld [vmem:[%s390_s1 + $0x30] sm:$0xff]  ;;  %v26_v11 = vld [vmem:[%s390_s1 + $0x38] sm:$0xff] }
   0x4   :  { %218 = vmatprep.subr.bf16.mxu0 %v217_v3  ;;  %214 = vmatprep.mubr.f32.mxu0 %v17_v9 }
   0x5   :  { %220 = vmatpush3.bf16.msra.mxu0 %v217_v3 }
   0x6   :  { %222 = vmatprep.subr.bf16.mxu0 %v221_v5 }
   0x7   :  { %10 = vsyncpa [#allocation3], 0  ;;  %v229_v12 = vpack.c.bf16 %v26_v11, %v25_v10  ;;  %v27_v13 = vld [vmem:[%s390_s1 + $0x40] sm:$0xff]  ;;  %v28_v14 = vld [vmem:[%s390_s1 + $0x48] sm:$0xff]  ;;  %vm117_vm0 = vcmask 130048   ;;  %vm140_vm1 = vcmask 64512  }
   0x8   :  { %v233_v15 = vpack.c.bf16 %v28_v14, %v27_v13  ;;  %v29_v16 = vld [vmem:[%s390_s1 + $0x50] sm:$0xff]  ;;  %v30_v17 = vld [vmem:[%s390_s1 + $0x58] sm:$0xff]  ;;  %v31_v19 = vld [vmem:[%s390_s1 + $0x60] sm:$0xff] }
   0x9   :  { %224 = vmatpush3.bf16.msra.mxu0 %v221_v5  ;;  %v237_v18 = vpack.c.bf16 %v30_v17, %v29_v16  ;;  %v32_v20 = vld [vmem:[%s390_s1 + $0x68] sm:$0xff]  ;;  %v33_v22 = vld [vmem:[%s390_s1 + $0x70] sm:$0xff]  ;;  %v34_v23 = vld [vmem:[%s390_s1 + $0x78] sm:$0xff] }
   0xa   :  { %226 = vmatprep.subr.bf16.mxu0 %v225_v8  ;;  %v241_v21 = vpack.c.bf16 %v32_v20, %v31_v19  ;;  %v245_v24 = vpack.c.bf16 %v34_v23, %v33_v22  ;;  %v18_v25 = vld [vmem:[%s389_s0 + $0x8] sm:$0xff]  ;;  %v163_v26 = vld [vmem:[%s391_s2] ss:$0 sm:$0xff]  ;;  %s285_s0 = smov 112   ;;  %s286_s2 = smov [#allocation2]  }
   0xb   :  { %s150_s30 = sshll.u32 %s286_s2, 4  ;;  %s151_s30 = int_to_ptr.vmem [resolvable:$true] %s150_s30 }
   0xc   :  { %p266_p1 = scmp.lt.s32.totalorder %s151_s30, %s151_s30 }
   0xd   :  { %228 = vmatpush3.bf16.msra.mxu0 %v225_v8 }
   0xe   :  { %230 = vmatprep.subr.bf16.mxu0 %v229_v12 }
  0x11   :  { %232 = vmatpush3.bf16.msra.mxu0 %v229_v12 }
  0x12   :  { %234 = vmatprep.subr.bf16.mxu0 %v233_v15 }
  0x15   :  { %236 = vmatpush3.bf16.msra.mxu0 %v233_v15 }
  0x16   :  { %238 = vmatprep.subr.bf16.mxu0 %v237_v18 }
  0x19   :  { %240 = vmatpush3.bf16.msra.mxu0 %v237_v18 }
  0x1a   :  { %242 = vmatprep.subr.bf16.mxu0 %v241_v21 }
  0x1d   :  { %244 = vmatpush3.bf16.msra.mxu0 %v241_v21 }
  0x1e   :  { %246 = vmatprep.subr.bf16.mxu0 %v245_v24 }
  0x21   :  { %248 = vmatpush3.bf16.msra.mxu0 %v245_v24 }
  0x24   :  { %215 = vmatmul.mubr.f32.vlgmr.msra.gmra.mrb[0].mxu0 %v18_v25 }
  0xf7   :  { %v216_v27 = vpop.f32.mrb[0].mxu0 }
  0xf8   :  { %v114_v28 = vadd.f32 %v216_v27, %v163_v26  ;;  %v108_v29 = vpop.f32.mrb[1].mxu0 }
  0xf9   :  { %v109_v30 = vadd.f32 %v163_v26, %v108_v29 }
  0xfa   :  { %119 = vst.msk [vmem:[%s392_s3 + $0x8] sm:$0xff] %vm117_vm0, %v114_v28  ;;  %v121_v31 = vsub.f32 0.0, %v114_v28 }
  0xfb   :  { %118 = vst.msk [vmem:[%s392_s3] sm:$0xff] %vm117_vm0, %v109_v30  ;;  %v120_v32 = vsub.f32 0.0, %v109_v30  ;;  %s261_s3 = scalar_lea.vmem %s151_s30, 256 }
  0xfc   :  { %v124_v33 = vmul.f32 1.442695, %v121_v31  ;;  %p262_p0 = scmp.ne.s32.totalorder %s151_s30, %s261_s3  ;;  %p267_p2 = scmp.lt.s32.totalorder %s261_s3, %s261_s3 }
  0xfd   :  { %v122_v34 = vmul.f32 1.442695, %v120_v32 }
  0xfe   :  { %253 = vpow2.f32 %v124_v33  ;;  %p268_p3 = por %p267_p2, %p266_p1 }
  0xff   :  { %255 = vpow2.f32 %v122_v34 }
 0x100   :  { %p269_p4 = pnand %p268_p3, %p262_p0 }
 0x108   :  { %v254_v35 = vpop.eup %253 }
 0x109   :  { %v256_v36 = vpop.eup %255  ;;  %v127_v38 = vadd.f32 1.0, %v254_v35 }
 0x10a   :  { %v126_v37 = vadd.f32 1.0, %v256_v36 }
 0x10c   :  { %257 = vrcp.f32 %v126_v37 }
 0x10d   :  { %259 = vrcp.f32 %v127_v38 }
 0x116   :  { %v258_v39 = vpop.eup %257 }
 0x117   :  { %134 = vrot.lane.b32.xlu0 %v258_v39, %s285_s0  ;;  %v260_v40 = vpop.eup %259 }
 0x11b   :  { %136 = vrot.lane.b32.xlu0 %v260_v40, %s285_s0 }
 0x189   :  { %v135_v41 = vpop.permute.xlu0 %134 }
 0x18a   :  { %141 = vst.msk [vmem:[#allocation2] sm:$0xff] %vm140_vm1, %v135_v41 }
 0x18d   :  { %v137_v42 = vpop.permute.xlu0 %136 }
 0x18e   :  { %142 = vst.msk [vmem:[#allocation2 + $0x8] sm:$0xff] %vm140_vm1, %v137_v42 }
 0x18f   :  { %272 = shalt.err (!%p269_p4)
}
 0x190   :  { %s273_s7 = scalar_lea.hbm %s393_s4, 256 }
 0x191   :  { %p274_p5 = scmp.ne.s32.totalorder %s393_s4, %s273_s7  ;;  %p277_p6 = scmp.lt.u32.totalorder %s273_s7, %s393_s4 }
 0x193   :  { %p279_p7 = pnand %p277_p6, %p274_p5 }
 0x195   :  { %282 = shalt.err (!%p279_p7)
}
 0x196   :  { %s287_s12 = smov 128   ;;  %s288_s13 = smov 8  }
 0x197   :  { %156 = dma.vmem_to_hbm [thread:$0]  %s151_s30, 256, %s393_s4, [#allocation3], %s287_s12, %s287_s12, %s288_s13  }
 0x198   :  { %283 = dma.done.wait [#allocation3], 256  }
 0x199   :  { %284 = vsyncadd [#allocation3], 4294967040 }
 0x19a   :  { %162 = vsyncpa [#allocation3], 1 }

</bundles_post_ra>
